<compile_context>
chip_gen: v6e
topology: v6e:2x2x1
jax: 0.10.0
libtpu: 0.0.40
codegen_flags: <defaults>
</compile_context>

<pallas_src>
import functools

import jax
import jax.numpy as jnp
import numpy as np
from jax.experimental import pallas as pl
from jax.experimental.pallas import tpu as pltpu

_C = 3  # number of vector components (fixed by the module)


@functools.cache
def _vmem_capacity_bytes() -> int:
    try:
        return int(pltpu.get_tpu_info().vmem_capacity_bytes)
    except Exception:
        return 64 * 1024 * 1024  # conservative default (v7x physical VMEM)


def _pick_d_tile(D, H, WC, itemsize, budget_bytes, n_batch):
    """Depth tile (divisor of D): largest that fits the VMEM budget, preferring
    tiles that leave >= 4 total grid steps (DMA pipelining + megacore split)."""
    hp = -(-H // 8) * 8
    wcp = -(-WC // 128) * 128
    plane = hp * wcp * itemsize

    def vmem(td):  # double-buffered in/halo/out blocks + in-kernel temporaries
        return (12 * td + 2) * plane

    divisors = [d for d in range(2, D + 1) if D % d == 0]
    if not divisors:
        return D
    fitting = [d for d in divisors if vmem(d) <= budget_bytes]
    if not fitting:
        return min(divisors)  # smallest tile; may still exceed the budget hint
    pipelined = [d for d in fitting if n_batch * (D // d) >= 4]
    return max(pipelined) if pipelined else max(fitting)


def _grad_body(v_ref, halo_ref, o_ref, *, sx, sy, sz):
    # v_ref:    (1, td, H, W*C)   channels-interleaved input tile (lane = w*3+c)
    # halo_ref: (1, 1,  H, W*C)   first depth plane of the next tile, or None
    # o_ref:    (1, 3, td, H, W*C) fused [d/dx, d/dy, d/dz] output tile
    v = v_ref[0]                                   # (td, H, WC)
    td, H, WC = v.shape

    # d/dx: forward diff along W == shift by C along the interleaved lane axis;
    #       trailing column replicates the last difference (F.pad on the diff).
    bx = v[:, :, _C:] - v[:, :, : WC - _C]         # (td, H, WC-3)
    dx = jnp.concatenate([bx, bx[:, :, -_C:]], axis=2)

    # d/dy: forward diff along H (sublanes); bottom row replicates.
    by = v[:, 1:, :] - v[:, : H - 1, :]            # (td, H-1, WC)
    dy = jnp.concatenate([by, by[:, -1:, :]], axis=1)

    if sx != 1.0:
        dx = dx * sx
    if sy != 1.0:
        dy = dy * sy
    o_ref[0, 0] = dx.astype(o_ref.dtype)
    o_ref[0, 1] = dy.astype(o_ref.dtype)

    # d/dz: forward diff along depth (cheap leading-axis slices).  The tile's
    #       last plane defaults to the replicated last valid difference (this
    #       is exactly right for the globally-last tile / untiled case).
    dz_main = v[1:] - v[: td - 1]                  # (td-1, H, WC)
    rep = v[td - 1] - v[td - 2]                    # (H, WC)
    if sz != 1.0:
        dz_main = dz_main * sz
        rep = rep * sz
    o_ref[0, 2, 0 : td - 1] = dz_main.astype(o_ref.dtype)
    o_ref[0, 2, td - 1] = rep.astype(o_ref.dtype)

    if halo_ref is not None:
        # Interior tile boundary: the last plane's forward difference uses the
        # first depth plane of the next tile (1-plane halo).
        @pl.when(pl.program_id(1) != pl.num_programs(1) - 1)
        def _():
            dz_last = halo_ref[0, 0] - v[td - 1]
            if sz != 1.0:
                dz_last = dz_last * sz
            o_ref[0, 2, td - 1] = dz_last.astype(o_ref.dtype)


def _grad_kernel_halo(v_ref, halo_ref, o_ref, *, sx, sy, sz):
    _grad_body(v_ref, halo_ref, o_ref, sx=sx, sy=sy, sz=sz)


def _grad_kernel_nohalo(v_ref, o_ref, *, sx, sy, sz):
    _grad_body(v_ref, None, o_ref, sx=sx, sy=sy, sz=sz)


def gradient_operator(v, transformation=False, *, d_tile=None):
    """v: (N, 3, D, H, W) -> (N, 3, D, H, W, 3);
    out[n, j, d, h, w, i] = d v_i / d axis_j (j = 0: x/W, 1: y/H, 2: z/D)."""
    N, C, D, H, W = v.shape
    assert C == _C, "GradientOperator expects a 3-component vector field"
    assert D >= 2 and H >= 2 and W >= 2
    WC = W * _C

    # Channels-last interleaved view: lane index = w*3 + c.  One small XLA copy
    # over the input (1/3 the size of the output); every in-kernel load/store
    # is then lane-dense and the output needs no post-kernel permutation.
    vi = jnp.transpose(v, (0, 2, 3, 4, 1)).reshape(N, D, H, WC)

    itemsize = jnp.dtype(v.dtype).itemsize
    cap = _vmem_capacity_bytes()
    vmem_limit = int(max(32 << 20, min(cap - (8 << 20), 112 << 20)))
    td = int(d_tile) if d_tile is not None else _pick_d_tile(
        D, H, WC, itemsize, int(vmem_limit * 0.7), N)
    assert 2 <= td <= D and D % td == 0, f"bad depth tile {td} for D={D}"
    nd = D // td

    if transformation:  # static pixel-spacing rescale: spacing = 2/(dim-1)
        sx, sy, sz = (W - 1) / 2.0, (H - 1) / 2.0, (D - 1) / 2.0
    else:
        sx = sy = sz = 1.0

    nelem = N * _C * D * H * W
    cost = pl.CostEstimate(
        flops=3 * nelem,
        transcendentals=0,
        bytes_accessed=(4 * nelem + (N * nd * H * WC if nd > 1 else 0)) * itemsize,
    )

    main_spec = pl.BlockSpec((1, td, H, WC), lambda n, dt: (n, dt, 0, 0))
    out_spec = pl.BlockSpec((1, 3, td, H, WC), lambda n, dt: (n, 0, dt, 0, 0))

    if nd > 1:
        kernel = functools.partial(_grad_kernel_halo, sx=sx, sy=sy, sz=sz)
        # 1-plane halo: first depth plane of the next tile (block size 1 along
        # depth => block index == element index; clamped at D-1 — the clamped
        # value is never used because the last tile keeps the replicate store).
        halo_spec = pl.BlockSpec(
            (1, 1, H, WC),
            lambda n, dt: (n, jnp.minimum((dt + 1) * td, D - 1), 0, 0))
        in_specs = [main_spec, halo_spec]
        args = (vi, vi)
    else:
        kernel = functools.partial(_grad_kernel_nohalo, sx=sx, sy=sy, sz=sz)
        in_specs = [main_spec]
        args = (vi,)

    out = pl.pallas_call(
        kernel,
        grid=(N, nd),
        in_specs=in_specs,
        out_specs=out_spec,
        out_shape=jax.ShapeDtypeStruct((N, 3, D, H, WC), v.dtype),
        compiler_params=pltpu.CompilerParams(
            dimension_semantics=("parallel", "parallel"),
            vmem_limit_bytes=vmem_limit,
        ),
        cost_estimate=cost,
    )(*args)

    # Free reshape (split of the contiguous minor dim): (..., W*3) -> (..., W, 3)
    # == exactly the torch.stack composition of the reference module.
    return out.reshape(N, 3, D, H, W, _C)


def _reference(v, transformation=False):
    """Pure-JAX mirror of GradientOperator.forward (F.pad applied to the diff)."""
    dw = v[..., 1:] - v[..., :-1]
    dvdx = jnp.concatenate([dw, dw[..., -1:]], axis=-1)
    dh = v[:, :, :, 1:, :] - v[:, :, :, :-1, :]
    dvdy = jnp.concatenate([dh, dh[:, :, :, -1:, :]], axis=3)
    dd = v[:, :, 1:] - v[:, :, :-1]
    dvdz = jnp.concatenate([dd, dd[:, :, -1:]], axis=2)
    if transformation:
        D, H, W = v.shape[2:]
        dvdx = dvdx * ((W - 1) / 2.0)
        dvdy = dvdy * ((H - 1) / 2.0)
        dvdz = dvdz * ((D - 1) / 2.0)
    g = jnp.stack([dvdx, dvdy, dvdz], axis=0)       # (3_j, N, C, D, H, W)
    return jnp.transpose(g, (1, 0, 3, 4, 5, 2))     # (N, 3_j, D, H, W, C)


if __name__ == "__main__":
    key = jax.random.PRNGKey(0)
    N, C, D, H, W = 2, 3, 4, 8, 16
    v = jax.random.normal(key, (N, C, D, H, W), dtype=jnp.float32)

    ref = jax.block_until_ready(_reference(v))

    # Default heuristic (prefers >= 4 grid steps -> exercises the halo path).
    out = jax.block_until_ready(gradient_operator(v))
    assert out.shape == (N, 3, D, H, W, 3), out.shape
    np.testing.assert_allclose(np.asarray(out), np.asarray(ref), rtol=1e-6, atol=1e-6)

    # Explicit D-tiled (halo) path.
    out_tiled = jax.block_until_ready(gradient_operator(v, d_tile=2))
    np.testing.assert_allclose(np.asarray(out_tiled), np.asarray(ref),
                               rtol=1e-6, atol=1e-6)

    # Untiled (no-halo kernel) path.
    out_full = jax.block_until_ready(gradient_operator(v, d_tile=D))
    np.testing.assert_allclose(np.asarray(out_full), np.asarray(ref),
                               rtol=1e-6, atol=1e-6)

    # transformation=True (static pixel-spacing rescale) path.
    out_t = jax.block_until_ready(gradient_operator(v, transformation=True))
    ref_t = jax.block_until_ready(_reference(v, transformation=True))
    np.testing.assert_allclose(np.asarray(out_t), np.asarray(ref_t),
                               rtol=1e-5, atol=1e-5)

    print("KERNEL_OK")
</pallas_src>

<mosaic_0001>
module attributes {stable_mosaic.version = 11 : i64} {
  func.func @_grad_kernel_halo(%arg0: i32, %arg1: i32, %arg2: memref<1x2x8x48xf32, #tpu.memory_space<vmem>>, %arg3: memref<1x1x8x48xf32, #tpu.memory_space<vmem>>, %arg4: memref<1x3x2x8x48xf32, #tpu.memory_space<vmem>>) attributes {dimension_semantics = [#tpu.dimension_semantics<parallel>, #tpu.dimension_semantics<parallel>], iteration_bounds = array<i64: 2, 2>, scalar_prefetch = 0 : i64, scratch_operands = 0 : i64, tpu.core_type = #tpu.core_type<tc>, window_params = [{transform_indices = @transform_0, window_bounds = array<i64: 1, 2, 8, 48>}, {transform_indices = @transform_1, window_bounds = array<i64: 1, 1, 8, 48>}, {transform_indices = @transform_2, window_bounds = array<i64: 1, 3, 2, 8, 48>}]} {
    %c0 = arith.constant 0 : index
    %c0_0 = arith.constant 0 : index
    %c0_1 = arith.constant 0 : index
    %c0_2 = arith.constant 0 : index
    %0 = vector.load %arg2[%c0, %c0_0, %c0_1, %c0_2] : memref<1x2x8x48xf32, #tpu.memory_space<vmem>>, vector<1x2x8x48xf32>
    %1 = vector.shape_cast %0 : vector<1x2x8x48xf32> to vector<2x8x48xf32>
    %2 = vector.extract_strided_slice %1 {offsets = [0, 0, 3], sizes = [2, 8, 45], strides = [1, 1, 1]} : vector<2x8x48xf32> to vector<2x8x45xf32>
    %3 = vector.extract_strided_slice %1 {offsets = [0, 0, 0], sizes = [2, 8, 45], strides = [1, 1, 1]} : vector<2x8x48xf32> to vector<2x8x45xf32>
    %4 = arith.subf %2, %3 : vector<2x8x45xf32>
    %5 = vector.extract_strided_slice %4 {offsets = [0, 0, 42], sizes = [2, 8, 3], strides = [1, 1, 1]} : vector<2x8x45xf32> to vector<2x8x3xf32>
    %6 = tpu.concatenate %4, %5 in 2 : vector<2x8x45xf32>, vector<2x8x3xf32> -> vector<2x8x48xf32>
    %7 = vector.extract_strided_slice %1 {offsets = [0, 1, 0], sizes = [2, 7, 48], strides = [1, 1, 1]} : vector<2x8x48xf32> to vector<2x7x48xf32>
    %8 = vector.extract_strided_slice %1 {offsets = [0, 0, 0], sizes = [2, 7, 48], strides = [1, 1, 1]} : vector<2x8x48xf32> to vector<2x7x48xf32>
    %9 = arith.subf %7, %8 : vector<2x7x48xf32>
    %10 = vector.extract_strided_slice %9 {offsets = [0, 6, 0], sizes = [2, 1, 48], strides = [1, 1, 1]} : vector<2x7x48xf32> to vector<2x1x48xf32>
    %11 = tpu.concatenate %9, %10 in 1 : vector<2x7x48xf32>, vector<2x1x48xf32> -> vector<2x8x48xf32>
    %c0_3 = arith.constant 0 : index
    %c0_4 = arith.constant 0 : index
    %c0_5 = arith.constant 0 : index
    %c0_6 = arith.constant 0 : index
    %c0_7 = arith.constant 0 : index
    %12 = vector.load %arg4[%c0_3, %c0_4, %c0_5, %c0_6, %c0_7] : memref<1x3x2x8x48xf32, #tpu.memory_space<vmem>>, vector<1x1x2x8x48xf32>
    %13 = vector.shape_cast %12 : vector<1x1x2x8x48xf32> to vector<2x8x48xf32>
    %14 = vector.shape_cast %6 : vector<2x8x48xf32> to vector<1x1x2x8x48xf32>
    tpu.vector_store %arg4[%c0_3, %c0_4, %c0_5, %c0_6, %c0_7], %14 {strides = array<i32>} : memref<1x3x2x8x48xf32, #tpu.memory_space<vmem>>, vector<1x1x2x8x48xf32>,
    %c0_8 = arith.constant 0 : index
    %c1 = arith.constant 1 : index
    %c0_9 = arith.constant 0 : index
    %c0_10 = arith.constant 0 : index
    %c0_11 = arith.constant 0 : index
    %15 = vector.load %arg4[%c0_8, %c1, %c0_9, %c0_10, %c0_11] : memref<1x3x2x8x48xf32, #tpu.memory_space<vmem>>, vector<1x1x2x8x48xf32>
    %16 = vector.shape_cast %15 : vector<1x1x2x8x48xf32> to vector<2x8x48xf32>
    %17 = vector.shape_cast %11 : vector<2x8x48xf32> to vector<1x1x2x8x48xf32>
    tpu.vector_store %arg4[%c0_8, %c1, %c0_9, %c0_10, %c0_11], %17 {strides = array<i32>} : memref<1x3x2x8x48xf32, #tpu.memory_space<vmem>>, vector<1x1x2x8x48xf32>,
    %18 = vector.extract_strided_slice %1 {offsets = [1, 0, 0], sizes = [1, 8, 48], strides = [1, 1, 1]} : vector<2x8x48xf32> to vector<1x8x48xf32>
    %19 = vector.extract_strided_slice %1 {offsets = [0, 0, 0], sizes = [1, 8, 48], strides = [1, 1, 1]} : vector<2x8x48xf32> to vector<1x8x48xf32>
    %20 = arith.subf %18, %19 : vector<1x8x48xf32>
    %21 = vector.extract_strided_slice %1 {offsets = [1, 0, 0], sizes = [1, 8, 48], strides = [1, 1, 1]} : vector<2x8x48xf32> to vector<1x8x48xf32>
    %22 = vector.shape_cast %21 : vector<1x8x48xf32> to vector<8x48xf32>
    %23 = vector.extract_strided_slice %1 {offsets = [0, 0, 0], sizes = [1, 8, 48], strides = [1, 1, 1]} : vector<2x8x48xf32> to vector<1x8x48xf32>
    %24 = vector.shape_cast %23 : vector<1x8x48xf32> to vector<8x48xf32>
    %25 = arith.subf %22, %24 : vector<8x48xf32>
    %c0_12 = arith.constant 0 : index
    %c2 = arith.constant 2 : index
    %c0_13 = arith.constant 0 : index
    %c0_14 = arith.constant 0 : index
    %c0_15 = arith.constant 0 : index
    %26 = vector.load %arg4[%c0_12, %c2, %c0_13, %c0_14, %c0_15] : memref<1x3x2x8x48xf32, #tpu.memory_space<vmem>>, vector<1x1x1x8x48xf32>
    %27 = vector.shape_cast %26 : vector<1x1x1x8x48xf32> to vector<1x8x48xf32>
    %28 = vector.shape_cast %20 : vector<1x8x48xf32> to vector<1x1x1x8x48xf32>
    tpu.vector_store %arg4[%c0_12, %c2, %c0_13, %c0_14, %c0_15], %28 {strides = array<i32>} : memref<1x3x2x8x48xf32, #tpu.memory_space<vmem>>, vector<1x1x1x8x48xf32>,
    %c0_16 = arith.constant 0 : index
    %c2_17 = arith.constant 2 : index
    %c1_18 = arith.constant 1 : index
    %c0_19 = arith.constant 0 : index
    %c0_20 = arith.constant 0 : index
    %29 = vector.load %arg4[%c0_16, %c2_17, %c1_18, %c0_19, %c0_20] : memref<1x3x2x8x48xf32, #tpu.memory_space<vmem>>, vector<1x1x1x8x48xf32>
    %30 = vector.shape_cast %29 : vector<1x1x1x8x48xf32> to vector<8x48xf32>
    %31 = vector.shape_cast %25 : vector<8x48xf32> to vector<1x1x1x8x48xf32>
    tpu.vector_store %arg4[%c0_16, %c2_17, %c1_18, %c0_19, %c0_20], %31 {strides = array<i32>} : memref<1x3x2x8x48xf32, #tpu.memory_space<vmem>>, vector<1x1x1x8x48xf32>,
    %c1_i32 = arith.constant 1 : i32
    %32 = arith.cmpi ne, %arg1, %c1_i32 : i32
    %33 = arith.extui %32 : i1 to i32
    %c0_i32 = arith.constant 0 : i32
    %34 = arith.cmpi ne, %33, %c0_i32 : i32
    scf.if %34 {
      %c0_21 = arith.constant 0 : index
      %c0_22 = arith.constant 0 : index
      %c0_23 = arith.constant 0 : index
      %c0_24 = arith.constant 0 : index
      %35 = vector.load %arg3[%c0_21, %c0_22, %c0_23, %c0_24] : memref<1x1x8x48xf32, #tpu.memory_space<vmem>>, vector<1x1x8x48xf32>
      %36 = vector.shape_cast %35 : vector<1x1x8x48xf32> to vector<8x48xf32>
      %37 = vector.extract_strided_slice %1 {offsets = [1, 0, 0], sizes = [1, 8, 48], strides = [1, 1, 1]} : vector<2x8x48xf32> to vector<1x8x48xf32>
      %38 = vector.shape_cast %37 : vector<1x8x48xf32> to vector<8x48xf32>
      %39 = arith.subf %36, %38 : vector<8x48xf32>
      %c0_25 = arith.constant 0 : index
      %c2_26 = arith.constant 2 : index
      %c1_27 = arith.constant 1 : index
      %c0_28 = arith.constant 0 : index
      %c0_29 = arith.constant 0 : index
      %40 = vector.load %arg4[%c0_25, %c2_26, %c1_27, %c0_28, %c0_29] : memref<1x3x2x8x48xf32, #tpu.memory_space<vmem>>, vector<1x1x1x8x48xf32>
      %41 = vector.shape_cast %40 : vector<1x1x1x8x48xf32> to vector<8x48xf32>
      %42 = vector.shape_cast %39 : vector<8x48xf32> to vector<1x1x1x8x48xf32>
      tpu.vector_store %arg4[%c0_25, %c2_26, %c1_27, %c0_28, %c0_29], %42 {strides = array<i32>} : memref<1x3x2x8x48xf32, #tpu.memory_space<vmem>>, vector<1x1x1x8x48xf32>,
    } else {
    }
    return
  }
  func.func @transform_0(%arg0: i32, %arg1: i32) -> (i32, i32, i32, i32) {
    %c0_i32 = arith.constant 0 : i32
    %c0_i32_0 = arith.constant 0 : i32
    %c0_i32_1 = arith.constant 0 : i32
    return %arg0, %arg1, %c0_i32, %c0_i32_0 : i32, i32, i32, i32
  }
  func.func @transform_1(%arg0: i32, %arg1: i32) -> (i32, i32, i32, i32) {
    %c1_i32 = arith.constant 1 : i32
    %0 = arith.addi %arg1, %c1_i32 : i32
    %c2_i32 = arith.constant 2 : i32
    %1 = arith.muli %0, %c2_i32 : i32
    %c3_i32 = arith.constant 3 : i32
    %2 = arith.minsi %1, %c3_i32 : i32
    %c0_i32 = arith.constant 0 : i32
    %c0_i32_0 = arith.constant 0 : i32
    %c0_i32_1 = arith.constant 0 : i32
    return %arg0, %2, %c0_i32, %c0_i32_0 : i32, i32, i32, i32
  }
  func.func @transform_2(%arg0: i32, %arg1: i32) -> (i32, i32, i32, i32, i32) {
    %c0_i32 = arith.constant 0 : i32
    %c0_i32_0 = arith.constant 0 : i32
    %c0_i32_1 = arith.constant 0 : i32
    %c0_i32_2 = arith.constant 0 : i32
    return %arg0, %c0_i32, %arg1, %c0_i32_0, %c0_i32_1 : i32, i32, i32, i32, i32
  }
}

</mosaic_0001>

<bundles_post_ra>
// kernel: tpu_custom_call.1
= control target key start
LH: loop header
LB: loop body
LE: loop exit
PB: predicated region body
PF: predicated region fallthrough
CT: control target
= control target key end

     0   :  { %s1076_s0 = inlined_call_operand.hbm [shape: f32[2,4,8,48], index: 0, kind: input, shape index: {}]   ;;  %s1077_s1 = inlined_call_operand.hbm [shape: f32[2,4,8,48], index: 1, kind: input, shape index: {}]   ;;  %s1078_s2 = inlined_call_operand.hbm [shape: f32[2,3,4,8,48], index: 2, kind: output, shape index: {}]  }
   0x1   :  { %1086 = sst [smem:[#allocation18_spill]] %s1076_s0 }
   0x2   :  { %7 = vsyncpa [#allocation3], 0 }
   0x3   :  { %9 = vsyncpa [#allocation3 + $0x1], 0 }
   0x4   :  { %10 = vsyncpa [#allocation6], 0 }
   0x5   :  { %12 = vsyncpa [#allocation6 + $0x1], 0 }
   0x6   :  { %13 = vsyncpa [#allocation4], 0 }
   0x7   :  { %15 = vsyncpa [#allocation4 + $0x1], 0  ;;  %s792_s9 = smov 0   ;;  %s794_s10 = smov 0  }
   0x8   :  { %s796_s11 = smov 0   ;;  %s798_s12 = smov 0  }
   0x9   :  { %s800_s13 = smov 0   ;;  %s802_s14 = smov 0  }
   0xa   :  { %s804_s15 = smov 0   ;;  %s806_s16 = smov 0  }
   0xb   :  { %s808_s17 = smov 0   ;;  %s810_s18 = smov 0  }
   0xc   :  { %s812_s19 = smov 0  }
   0xd LB: > { %1087 = sst [smem:[#allocation13_spill]] %s754_s17  ;;  %s450_s20 = sadd.s32 4294967294, %s762_s19   ;;  %s762_s19 = sphi %s812_s19, %s21_s19   ;;  %s758_s18 = sphi %s810_s18, %s1111_s18   ;;  %s754_s17 = sphi %s808_s17, %s1110_s17   ;;  %s750_s16 = sphi %s806_s16, %s1109_s16   ;;  %s746_s15 = sphi %s804_s15, %s1108_s15   ;;  %s742_s14 = sphi %s802_s14, %s1117_s14   ;;  %s738_s13 = sphi %s800_s13, %s1116_s13   ;;  %s734_s12 = sphi %s798_s12, %s1115_s12   ;;  %s730_s11 = sphi %s796_s11, %s1114_s11   ;;  %s726_s10 = sphi %s794_s10, %s1113_s10   ;;  %s722_s9 = sphi %s792_s9, %s1112_s9  }
   0xe   : > { %1088 = sst [smem:[#allocation14_spill]] %s758_s18  ;;  %s42_s21 = sadd.s32 1, %s742_s14 }
   0xf   : > { %p1079_p0 = scmp.ne.s32.totalorder %s742_s14, %s738_s13  ;;  %p50_p1 = scmp.eq.s32.totalorder %s762_s19, 0 }
  0x10   : > { %p55_p2 = scmp.ne.s32.totalorder %s738_s13, %s734_s12  ;;  %s476_s22 = sshll.u32 %s754_s17, 1 }
  0x11   : > { %p860_p3 = por %p50_p1, %p1079_p0  ;;  %p123_p4 = scmp.eq.s32.totalorder %s450_s20, 3 }
  0x12   : > { %p507_p5 = scmp.lt.s32.totalorder %s762_s19, 4  ;;  %s143_s25 = sand.u32 1, %s742_s14  }
  0x13   : > { %p868_p6 = por %p123_p4, %p55_p2  ;;  %s455_s26 = sshll.u32 %s143_s25, 4 }
  0x14   : > { %s1080_s27 = sshll.u32 %s758_s18, 2  ;;  %s147_s29 = scalar_lea.vmem [#allocation2], %s455_s26 }
  0x15   : > { %s1090_s24 = scalar_select %p868_p6, 1, 0 }
  0x16   : > { %s153_s28 = sadd.s32 %s476_s22, %s1080_s27  ;;  %s156_s30 = sshll.u32 %s147_s29, 4  ;;  %s157_s30 = int_to_ptr.vmem [resolvable:$true] %s156_s30 }
  0x17   : > { %s458_s3 = sshll.u32 %s153_s28, 7  ;;  %s1091_s0 = sld [smem:[#allocation18_spill]] }
  0x18   : > { %p885_p7 = pnand %p507_p5, %p860_p3  ;;  %p463_p8 = scmp.ge.s32.totalorder %s762_s19, 1 }
  0x19   : > { %s144_s8 = scalar_lea.sflag [#allocation3], %s143_s25  ;;  %s621_s20 = scalar_lea.vmem %s157_s30, 256 }
  0x1a   : > { %p610_p9 = pneg %p885_p7  ;;  %p622_p10 = scmp.ne.s32.totalorder %s157_s30, %s621_s20 }
  0x1b   : > { %s764_s26 = smov [#allocation2]  }
  0x1c   : > { %p624_p11 = pnand %p622_p10, %p610_p9  ;;  %s626_s28 = sshll.u32 %s764_s26, 4  ;;  %s627_s28 = int_to_ptr.vmem [resolvable:$false] %s626_s28 }
  0x1d   : > { %s155_s6 = scalar_lea.hbm %s1091_s0, %s458_s3  ;;  %s628_s29 = scalar_lea.vmem %s627_s28, 512 }
  0x1e   : > { %p625_p12 = pneg %p624_p11  ;;  %p629_p13 = scmp.lt.s32.totalorder %s157_s30, %s627_s28 }
  0x1f   : > { %p630_p4 = scmp.lt.s32.totalorder %s628_s29, %s621_s20 }
  0x21   : > { %p631_p0 = por %p630_p4, %p629_p13 }
  0x23   : > { %p632_p3 = pnand %p631_p0, %p625_p12 }
  0x25   : > { %635 = shalt.err (!%p632_p3)
}
  0x26   : > { %s765_s23 = smov 128   ;;  %s766_s25 = smov 8  }
  0x27   : > { %499 = dma.hbm_to_vmem [thread:$0]  (!%p885_p7), %s155_s6, 256, %s157_s30, %s144_s8, %s765_s23, %s765_s23, %s766_s25  }
  0x28   : > { %p188_p9 = scmp.lt.s32.totalorder %s762_s19, 5  ;;  %s449_s4 = sadd.s32 4294967295, %s762_s19  }
  0x29   : > { %s30_s5 = sadd.s32 1, %s754_s17  ;;  %s33_s20 = sadd.s32 1, %s758_s18 }
  0x2a   : > { %p897_p0 = pnand %p463_p8, %p188_p9  ;;  %p31_p10 = scmp.ge.s32.totalorder %s30_s5, 2 }
  0x2b   : > { %p904_p11 = scmp.eq.s32.totalorder %s449_s4, 0  ;;  %s477_s7 = sadd.s32 2, %s476_s22 }
  0x2c   : > { %s1119_s5 = smov (%p31_p10, %s30_s5), 0  ;;  %s1121_s20 = smov (!%p31_p10, %s33_s20), %s758_s18 }
  0x2d   : > { %1095 = sst [smem:[#allocation15_spill]] %s1119_s5  ;;  %s38_s30 = ssub.s32 %s754_s17, %s1119_s5 }
  0x2e   : > { %p920_p7 = por %p904_p11, %p55_p2  ;;  %p35_p8 = scmp.ge.s32.totalorder %s1121_s20, 2 }
  0x2f   : > { %p67_p12 = scmp.lt.s32.totalorder %s477_s7, 3  ;;  %s478_s22 = sshll.u32 %s1119_s5, 1 }
  0x30   : > { %s78_s8 = sadd.s32 1, %s730_s11  ;;  %s1123_s20 = smov (%p35_p8, %s1121_s20), 0 }
  0x31   : > { %1097 = sst [smem:[#allocation16_spill]] %s1123_s20  ;;  %s1125_s7 = smov (!%p67_p12, %s477_s7), 3 }
  0x32   : > { %s37_s28 = ssub.s32 %s758_s18, %s1123_s20  ;;  %s479_s29 = sadd.s32 2, %s478_s22 }
  0x33   : > { %s39_s23 = sor.u32 %s38_s30, %s37_s28  ;;  %p71_p2 = scmp.lt.s32.totalorder %s479_s29, 3 }
  0x34   : > { %p40_p13 = scmp.eq.s32.totalorder %s39_s23, 0  ;;  %p85_p4 = scmp.ne.s32.totalorder %s730_s11, %s726_s10 }
  0x35   : > { %s1127_s29 = smov (!%p71_p2, %s479_s29), 3  ;;  %p91_p9 = scmp.ne.s32.totalorder %s726_s10, %s722_s9 }
  0x36   : > { %s935_s25 = scalar_select %p40_p13, %s742_s14, %s42_s21  }
  0x37   : > { %s74_s27 = ssub.s32 %s1125_s7, %s1127_s29  ;;  %p939_p3 = por %p85_p4, %p50_p1 }
  0x38   : > { %1098 = sst [smem:[#allocation17_spill]] %s935_s25  ;;  %s75_s22 = sor.u32 %s74_s27, %s37_s28 }
  0x39   : > { %p76_p10 = scmp.eq.s32.totalorder %s75_s22, 0  ;;  %p117_p8 = scmp.eq.s32.totalorder %s449_s4, 3 }
  0x3a   : > { %p947_p12 = por %p91_p9, %p904_p11  ;;  %s166_s23 = sand.u32 1, %s730_s11  }
  0x3b   : > { %s953_s21 = scalar_select %p76_p10, %s730_s11, %s78_s8  }
  0x3c   : > { %p1101_p2 = scmp.ne.s32.totalorder %s742_s14, %s738_s13  ;;  %s459_s20 = sshll.u32 %s166_s23, 3 }
  0x3d   : > { %s1103_s5 = sshll.u32 %s758_s18, 2  ;;  %s170_s26 = scalar_lea.vmem [#allocation5], %s459_s20 }
  0x3e   : > { %p958_p13 = por %p117_p8, %p1101_p2  ;;  %s179_s17 = sadd.s32 %s1103_s5, %s1125_s7 }
  0x3f   : > { %s462_s27 = sshll.u32 %s179_s17, 7  ;;  %s183_s22 = sshll.u32 %s170_s26, 4  ;;  %s184_s22 = int_to_ptr.vmem [resolvable:$true] %s183_s22 }
  0x40   : > { %s1102_s29 = scalar_select %p958_p13, 1, 0 }
  0x41   : > { %s181_s4 = scalar_lea.hbm %s1077_s1, %s462_s27  ;;  %p971_p1 = pnand %p507_p5, %p939_p3 }
  0x42   : > { %s167_s25 = scalar_lea.sflag [#allocation6], %s166_s23  ;;  %s649_s18 = scalar_lea.vmem %s184_s22, 128 }
  0x43   : > { %p638_p11 = pneg %p971_p1  ;;  %p650_p4 = scmp.ne.s32.totalorder %s184_s22, %s649_s18 }
  0x44   : > { %s767_s17 = smov [#allocation5]  }
  0x45   : > { %p652_p9 = pnand %p650_p4, %p638_p11  ;;  %s654_s5 = sshll.u32 %s767_s17, 4  ;;  %s655_s5 = int_to_ptr.vmem [resolvable:$false] %s654_s5 }
  0x46   : > { %s656_s20 = scalar_lea.vmem %s655_s5, 256  ;;  %p657_p8 = scmp.lt.s32.totalorder %s184_s22, %s655_s5 }
  0x47   : > { %p653_p10 = pneg %p652_p9  ;;  %p658_p2 = scmp.lt.s32.totalorder %s656_s20, %s649_s18 }
  0x49   : > { %p659_p6 = por %p658_p2, %p657_p8 }
  0x4b   : > { %p660_p13 = pnand %p659_p6, %p653_p10 }
  0x4d   : > { %663 = shalt.err (!%p660_p13)
}
  0x4e   : > { %502 = dma.hbm_to_vmem [thread:$0]  (!%p971_p1), %s181_s4, 128, %s184_s22, %s167_s25  }
  0x4f   : > { %192 = sbr.rel (%p897_p0) target bundleno = 344 (0x158), region = 28  ;;  %s982_s0 = sand.u32 (!%p897_p0), 1, %s738_s13  }
  0x50   : > { %s464_s7 = sshll.u32 (!%p897_p0), %s982_s0, 4  ;;  %s195_s23 = scalar_lea.sflag (!%p897_p0), [#allocation3], %s982_s0 }
  0x51   : > { %s198_s27 = scalar_lea.vmem (!%p897_p0), [#allocation2], %s464_s7 }
  0x54   : > { %709 = dma.done.wait (%p920_p7), %s195_s23, 256  }
  0x55   : > { %711 = vsyncadd (%p920_p7), %s195_s23, 4294967040  ;;  %s203_s18 = sand.u32 1, %s726_s10  }
  0x56   : > { %s991_s25 = sshll.u32 %s203_s18, 3  ;;  %s204_s3 = scalar_lea.sflag [#allocation6], %s203_s18 }
  0x57   : > { %s207_s9 = scalar_lea.vmem [#allocation5], %s991_s25 }
  0x58   : > { %713 = dma.done.wait (%p947_p12), %s204_s3, 128  }
  0x59   : > { %715 = vsyncadd (%p947_p12), %s204_s3, 4294967168  ;;  %s482_s28 = smul.u32 48, %s982_s0  ;;  %v239_v0 = vld [vmem:[%s198_s27] sm:$0xff]  ;;  %v240_v1 = vld [vmem:[%s198_s27 + $0x8] sm:$0xff]  ;;  %s768_s4 = smov 3   ;;  %vm277_vm0 = vcmask 392192  }
  0x5a   : > { %243 = vrot.lane.b32.xlu0 %v239_v0, %s768_s4  ;;  %v262_v2 = vrot.slane %v239_v0, 7  ;;  %v263_v3 = vrot.slane %v240_v1, 7  ;;  %v283_v4 = vsub.f32 %v240_v1, %v239_v0  ;;  %vm274_vm1 = vcmask 1046528   ;;  %s769_s30 = smov 125   ;;  %p470_p5 = scmp.eq.s32.totalorder %s746_s15, 1 }
  0x5b   : > { %s999_s6 = scalar_lea.vmem [#allocation7], %s482_s28  ;;  %vm259_vm2 = vcmask 367616  }
  0x5c   : > { %v266_v5 = vsub.f32 %v239_v0, %v262_v2  ;;  %v267_v6 = vsub.f32 %v240_v1, %v263_v3  ;;  %468 = vst.msk [vmem:[%s999_s6 + $0x20] sm:$0xff] %vm277_vm0, %v283_v4  ;;  %469 = vst.msk [vmem:[%s999_s6 + $0x28] sm:$0xff] %vm277_vm0, %v283_v4 }
  0x5e   : > { %v270_v7 = vrot.slane %v266_v5, 1  ;;  %v271_v8 = vrot.slane %v267_v6, 1  ;;  %245 = vrot.lane.b32.xlu0 %v240_v1, %s768_s4 }
  0x60   : > { %v275_v9 = vsel %vm274_vm1, %v270_v7, %v266_v5  ;;  %v276_v10 = vsel %vm274_vm1, %v271_v8, %v267_v6 }
  0x61   : > { %467 = vst.msk [vmem:[%s999_s6 + $0x18] sm:$0xff] %vm277_vm0, %v276_v10  ;;  %466 = vst.msk [vmem:[%s999_s6 + $0x10] sm:$0xff] %vm277_vm0, %v275_v9 }
  0xcc   : > { %v244_v11 = vpop.permute.xlu0 %243 }
  0xcd   : > { %v249_v12 = vsub.f32 %v239_v0, %v244_v11 }
  0xcf   : > { %253 = vrot.lane.b32.xlu1 %v249_v12, %s769_s30 }
  0xd0   : > { %v246_v13 = vpop.permute.xlu0 %245 }
  0xd1   : > { %v250_v14 = vsub.f32 %v240_v1, %v246_v13 }
  0xd3   : > { %255 = vrot.lane.b32.xlu1 %v250_v14, %s769_s30 }
 0x141   : > { %v254_v15 = vpop.permute.xlu1 %253 }
 0x142   : > { %v260_v16 = vsel %vm259_vm2, %v254_v15, %v249_v12 }
 0x143   : > { %278 = vst.msk [vmem:[%s999_s6] sm:$0xff] %vm277_vm0, %v260_v16  ;;  %291 = sbr.rel (%p470_p5) target bundleno = 332 (0x14c), region = 40 }
 0x145   : > { %v256_v17 = vpop.permute.xlu1 %255 }
 0x146   : > { %v261_v18 = vsel %vm259_vm2, %v256_v17, %v250_v14 }
 0x147   : > { %279 = vst.msk [vmem:[%s999_s6 + $0x8] sm:$0xff] %vm277_vm0, %v261_v18 }
 0x148   : > { %v292_v19 = vld [vmem:[%s207_s9] sm:$0xff] }
 0x149   : > { %v293_v20 = vsub.f32 %v292_v19, %v240_v1 }
 0x14b   : > { %471 = vst.msk [vmem:[%s999_s6 + $0x28] sm:$0xff] %vm277_vm0, %v293_v20 }
 0x14c PF: > { %s296_s26 = scalar_lea.sflag [#allocation4], %s982_s0 }
 0x14d   : > { %s472_s22 = sshll.u32 %s746_s15, 1  ;;  %s483_s8 = smul.u32 12, %s750_s16 }
 0x14e   : > { %s321_s17 = sshll.u32 %s999_s6, 4  ;;  %s770_s7 = smov 256   ;;  %s322_s17 = int_to_ptr.vmem [resolvable:$true] %s321_s17 }
 0x14f   : > { %s308_s5 = sadd.s32 %s483_s8, %s472_s22  ;;  %p1105_p6 = scmp.ne.s32.totalorder %s1102_s29, 0 }
 0x150   : > { %s473_s20 = sshll.u32 %s308_s5, 7  ;;  %s771_s18 = smov 512  }
 0x151   : > { %488 = sst [smem:[#allocation9]] (%p1105_p6), %s770_s7  ;;  %s310_s27 = scalar_lea.hbm %s1078_s2, %s473_s20 }
 0x152   : > { %489 = sst [smem:[#allocation9 + $0x1]] (%p1105_p6), %s771_s18  ;;  %s772_s25 = smov 2  }
 0x153   : > { %490 = sst [smem:[#allocation9 + $0x2]] (%p1105_p6), %s772_s25  ;;  %s773_s15 = smov 128  }
 0x154   : > { %491 = sst [smem:[#allocation9 + $0x3]] (%p1105_p6), %s773_s15  ;;  %s774_s16 = smov 8  }
 0x155   : > { %492 = sst [smem:[#allocation9 + $0x4]] (%p1105_p6), %s773_s15  ;;  %s775_s3 = smov 131072  }
 0x156   : > { %493 = sst [smem:[#allocation9 + $0x5]] (%p1105_p6), %s774_s16  ;;  %s776_s9 = smov 0  }
 0x157   : > { %494 = dma.general (%p1105_p6), %s322_s17, 768, %s310_s27, %s296_s26, %s775_s3, [#allocation9], %s776_s9, 0  }
 0x158 PF: > { %p508_p0 = scmp.ge.s32.totalorder %s762_s19, 2  ;;  %s349_s28 = sand.u32 1, %s734_s12  }
 0x159   : > { %p1106_p7 = scmp.ne.s32.totalorder %s1090_s24, 0  ;;  %s350_s4 = scalar_lea.sflag [#allocation4], %s349_s28 }
 0x15b   : > { %p504_p3 = pnand %p508_p0, %p1106_p7 }
 0x15d   : > { %p505_p12 = pneg %p504_p3 }
 0x15f   : > { %717 = dma.done.wait (%p505_p12), %s350_s4, 768  }
 0x160   : > { %719 = vsyncadd (%p505_p12), %s350_s4, 4294966528  ;;  %s21_s19 = sadd.s32 1, %s762_s19   ;;  %s1107_s29 = sld [smem:[#allocation17_spill]] }
 0x161   : > { %p18_p13 = scmp.ge.s32.totalorder %s21_s19, 6   ;;  %s1108_s15 = sld [smem:[#allocation13_spill]] }
 0x162   : > { %s1109_s16 = sld [smem:[#allocation14_spill]]  ;;  %s1112_s9 = smov %s726_s10 }
 0x163   : > { %s1110_s17 = sld [smem:[#allocation15_spill]]  ;;  %s1113_s10 = smov %s730_s11 }
 0x164   : > { %s1111_s18 = sld [smem:[#allocation16_spill]]  ;;  %s1114_s11 = smov %s953_s21 }
 0x165   : > { %s1115_s12 = smov %s738_s13  ;;  %s1116_s13 = smov %s742_s14 }
 0x166   : > { %s1117_s14 = smov %s1107_s29  ;;  %20 = sbr.rel (!%p18_p13) target bundleno = 13 (0xd), region = 98 }
 0x16b   :  { %355 = vsyncpa [#allocation3], 1 }
 0x16c   :  { %357 = vsyncpa [#allocation3 + $0x1], 1 }
 0x16d   :  { %358 = vsyncpa [#allocation6], 1 }
 0x16e   :  { %360 = vsyncpa [#allocation6 + $0x1], 1 }
 0x16f   :  { %361 = vsyncpa [#allocation4], 1 }
 0x170   :  { %363 = vsyncpa [#allocation4 + $0x1], 1 }

</bundles_post_ra>
